<compile_context>
chip_gen: v5e
topology: v5e:2x2
jax: 0.10.0
libtpu: 0.0.40
codegen_flags: <defaults>
</compile_context>

<pallas_src>
import functools

import jax
import jax.numpy as jnp
from jax import lax
from jax.experimental import pallas as pl
from jax.experimental.pallas import tpu as pltpu

_LANE = 128
_H_RESIDENT_MAX_BYTES = 8 * 1024 * 1024   # keep h fully VMEM-resident below this


def _round_up(v, m):
    return (v + m - 1) // m * m


def _pad2(a, rows, cols):
    return jnp.pad(a, ((0, rows - a.shape[0]), (0, cols - a.shape[1])))


def _pick_tile(n_pad, candidates):
    for c in candidates:
        if c <= n_pad and n_pad % c == 0:
            return c
    return n_pad


# ---------------------------------------------------------------------------
# Kernel 1: fused projection  [h | skip] = x @ [Wl | Wr] + [0 | b]
# ---------------------------------------------------------------------------
def _proj_kernel(x_ref, w_ref, b_ref, h_ref, skip_ref):
    proj = jnp.dot(x_ref[...], w_ref[...],
                   preferred_element_type=jnp.float32) + b_ref[...]
    f = h_ref.shape[-1]
    h_ref[...] = proj[:, :f].astype(jnp.bfloat16)   # aggregated branch (bf16)
    skip_ref[...] = proj[:, f:]                     # root/skip branch + bias (f32)


def _project(x_bf16, w_cat_bf16, b_cat, f_out_pad, *, tm):
    n_pad, f_in_pad = x_bf16.shape
    return pl.pallas_call(
        _proj_kernel,
        out_shape=(jax.ShapeDtypeStruct((n_pad, f_out_pad), jnp.bfloat16),
                   jax.ShapeDtypeStruct((n_pad, f_out_pad), jnp.float32)),
        grid=(n_pad // tm,),
        in_specs=[
            pl.BlockSpec((tm, f_in_pad), lambda i: (i, 0)),
            pl.BlockSpec((f_in_pad, 2 * f_out_pad), lambda i: (0, 0)),
            pl.BlockSpec((1, 2 * f_out_pad), lambda i: (0, 0)),
        ],
        out_specs=(
            pl.BlockSpec((tm, f_out_pad), lambda i: (i, 0)),
            pl.BlockSpec((tm, f_out_pad), lambda i: (i, 0)),
        ),
        compiler_params=pltpu.CompilerParams(dimension_semantics=("parallel",)),
    )(x_bf16, w_cat_bf16, b_cat)


# ---------------------------------------------------------------------------
# Kernel 2: mean-aggregation  out = inv_deg * (M @ h) + skip  (+ ReLU / lsm)
# ---------------------------------------------------------------------------
def _agg_kernel(m_ref, h_ref, skip_ref, invdeg_ref, o_ref, *,
                tk, f_out_true, apply_relu, apply_log_softmax, h_resident):
    k = pl.program_id(1)

    @pl.when(k == 0)
    def _():
        o_ref[...] = jnp.zeros_like(o_ref)

    if h_resident:
        start = pl.multiple_of(k * tk, tk)
        h = h_ref[pl.ds(start, tk), :]
    else:
        h = h_ref[...]
    m = m_ref[...].astype(jnp.bfloat16)            # int8 counts -> bf16 for MXU
    o_ref[...] += jnp.dot(m, h, preferred_element_type=jnp.float32)

    @pl.when(k == pl.num_programs(1) - 1)
    def _():
        n_chunks = o_ref.shape[0] // _LANE

        def body(c, carry):
            rows = pl.ds(pl.multiple_of(c * _LANE, _LANE), _LANE)
            out = invdeg_ref[rows, :] * o_ref[rows, :] + skip_ref[rows, :]
            if apply_relu:
                out = jnp.maximum(out, 0.0)
            if apply_log_softmax:
                # mask padded lanes so they don't contribute to the row softmax
                lane = lax.broadcasted_iota(jnp.int32, out.shape, 1)
                out = jnp.where(lane < f_out_true, out, -1e30)
                mx = jnp.max(out, axis=1, keepdims=True)
                s = out - mx
                lse = jnp.log(jnp.sum(jnp.exp(s), axis=1, keepdims=True))
                out = s - lse
            o_ref[rows, :] = out
            return carry

        lax.fori_loop(0, n_chunks, body, 0, unroll=True)


def sage_conv(mask_i8, inv_deg, x_bf16, w_l, w_r, b, *, relu, log_softmax,
              f_out_true, tm, tk):
    """One SAGEConv layer on padded inputs.

    mask_i8: (Np, Np) int8 edge-count matrix (row i aggregates column j).
    inv_deg: (Np, 1) f32 exact 1/deg (0 for isolated / padded rows).
    x_bf16:  (Np, Fin_pad) bf16; w_l/w_r: (Fin_pad, Fout_pad) f32; b: (1, Fout_pad).
    Returns (Np, Fout_pad) f32.
    """
    n_pad = mask_i8.shape[0]
    f_out_pad = w_l.shape[1]

    # fused projection: h = x@Wl (bf16), skip = x@Wr + b (f32)
    w_cat = jnp.concatenate([w_l, w_r], axis=1).astype(jnp.bfloat16)
    b_cat = jnp.concatenate([jnp.zeros_like(b), b], axis=1)
    h, skip = _project(x_bf16, w_cat, b_cat, f_out_pad, tm=tm)

    h_resident = n_pad * f_out_pad * 2 <= _H_RESIDENT_MAX_BYTES
    if h_resident:
        h_spec = pl.BlockSpec((n_pad, f_out_pad), lambda i, k: (0, 0))
    else:
        h_spec = pl.BlockSpec((tk, f_out_pad), lambda i, k: (k, 0))

    kernel = functools.partial(
        _agg_kernel, tk=tk, f_out_true=f_out_true,
        apply_relu=relu, apply_log_softmax=log_softmax, h_resident=h_resident)

    # VMEM budget (double-buffered streams); raise scoped limit explicitly
    # (v5e default 16 MiB, v6e/v7x 32 MiB) but stay below v7x's 64 MiB per TC.
    vmem_need = 2 * tm * tk                                        # A (int8)
    vmem_need += (2 * n_pad * f_out_pad if h_resident else 4 * tk * f_out_pad)
    vmem_need += 2 * tm * f_out_pad * 4                            # skip (f32)
    vmem_need += 2 * tm * f_out_pad * 4                            # out (f32)
    vmem_need += 2 * tm * _LANE * 4                                # inv_deg
    vmem_limit = int(min(max(vmem_need + (8 << 20), 32 << 20), 48 << 20))

    flops = 2 * n_pad * n_pad * f_out_pad
    h_bytes = (n_pad * f_out_pad * 2 if h_resident
               else (n_pad // tm) * n_pad * f_out_pad * 2)
    bytes_accessed = (n_pad * n_pad            # A (int8)
                      + h_bytes                # h (bf16)
                      + n_pad * f_out_pad * 4  # skip (f32)
                      + n_pad * 4              # inv_deg
                      + n_pad * f_out_pad * 4)  # out (f32)
    transcendentals = n_pad * f_out_pad if log_softmax else 0

    return pl.pallas_call(
        kernel,
        out_shape=jax.ShapeDtypeStruct((n_pad, f_out_pad), jnp.float32),
        grid=(n_pad // tm, n_pad // tk),
        in_specs=[
            pl.BlockSpec((tm, tk), lambda i, k: (i, k)),           # A tile
            h_spec,                                                # h (resident/streamed)
            pl.BlockSpec((tm, f_out_pad), lambda i, k: (i, 0)),    # skip tile
            pl.BlockSpec((tm, 1), lambda i, k: (i, 0)),            # 1/deg column
        ],
        out_specs=pl.BlockSpec((tm, f_out_pad), lambda i, k: (i, 0)),
        compiler_params=pltpu.CompilerParams(
            dimension_semantics=("parallel", "arbitrary"),
            vmem_limit_bytes=vmem_limit),
        cost_estimate=pl.CostEstimate(flops=flops,
                                      transcendentals=transcendentals,
                                      bytes_accessed=bytes_accessed),
    )(mask_i8, h, skip, inv_deg)


# ---------------------------------------------------------------------------
# Glue: adjacency construction + parameter setup (plain JAX)
# ---------------------------------------------------------------------------
def build_mask_and_invdeg(edge_index, num_nodes, n_pad):
    """int8 edge-count mask M (M[i,j] = #edges j -> i) and exact f32 1/deg,
    padded to n_pad (padded rows/cols stay zero)."""
    del num_nodes
    src = edge_index[0]
    dst = edge_index[1]
    # TODO(synk): for very large graphs build the mask in row blocks (or use a
    # CSR gather) instead of a dense int32 scatter intermediate.
    counts = jnp.zeros((n_pad, n_pad), jnp.int32).at[dst, src].add(1)
    counts = jnp.clip(counts, 0, 127)            # int8-exact edge multiplicity
    deg = jnp.sum(counts, axis=1, keepdims=True).astype(jnp.float32)
    inv_deg = jnp.where(deg > 0, 1.0 / jnp.maximum(deg, 1.0), 0.0)
    return counts.astype(jnp.int8), inv_deg


def init_sage_params(key, in_channels, hidden_channels, out_channels, num_layers=2):
    """Each SAGEConv has W_l, W_r (Fin, Fout) and bias (1, Fout)."""
    dims = [(in_channels, hidden_channels)]
    dims += [(hidden_channels, hidden_channels)] * (num_layers - 1)
    dims += [(hidden_channels, out_channels)]           # out_conv
    params = []
    for (fin, fout) in dims:
        key, k1, k2 = jax.random.split(key, 3)
        scale = 1.0 / jnp.sqrt(jnp.float32(fin))
        w_l = jax.random.normal(k1, (fin, fout), jnp.float32) * scale
        w_r = jax.random.normal(k2, (fin, fout), jnp.float32) * scale
        b = jnp.zeros((1, fout), jnp.float32)
        params.append((w_l, w_r, b))
    return params


def graphsage_forward(x, edge_index, params, num_layers=2):
    n, f_in = x.shape
    n_pad = _round_up(n, _LANE)
    # Largest tiles that divide the padded node count (no quadratic A padding);
    # reduction (k) axis is last in the grid.
    tm = _pick_tile(n_pad, (512, 256, 128))
    tk = _pick_tile(n_pad, (2048, 1024, 512, 256, 128))

    mask, inv_deg = build_mask_and_invdeg(edge_index, n, n_pad)

    f_in_pad = _round_up(f_in, _LANE)
    x_pad = _pad2(x, n_pad, f_in_pad).astype(jnp.bfloat16)

    # hidden SAGEConv layers with fused ReLU
    for layer in range(num_layers):
        w_l, w_r, b = params[layer]
        fin, fout = w_l.shape
        fin_p, fout_p = _round_up(fin, _LANE), _round_up(fout, _LANE)
        out = sage_conv(mask, inv_deg, x_pad,
                        _pad2(w_l, fin_p, fout_p), _pad2(w_r, fin_p, fout_p),
                        _pad2(b, 1, fout_p),
                        relu=True, log_softmax=False,
                        f_out_true=fout, tm=tm, tk=tk)
        x_pad = out.astype(jnp.bfloat16)   # next projection consumes bf16

    # output SAGEConv + fused masked row-wise log_softmax (kept in f32)
    w_l, w_r, b = params[-1]
    fin, fout = w_l.shape
    fin_p, fout_p = _round_up(fin, _LANE), _round_up(fout, _LANE)
    out_pad = sage_conv(mask, inv_deg, x_pad,
                        _pad2(w_l, fin_p, fout_p), _pad2(w_r, fin_p, fout_p),
                        _pad2(b, 1, fout_p),
                        relu=False, log_softmax=True,
                        f_out_true=fout, tm=tm, tk=tk)
    return out_pad[:n, :fout]


def _reference_forward(x, edge_index, params, num_layers):
    """Pure-JAX f32 reference matching the PyTorch module semantics."""
    n = x.shape[0]
    src, dst = edge_index[0], edge_index[1]
    counts = jnp.zeros((n, n), jnp.float32).at[dst, src].add(1.0)
    deg = jnp.sum(counts, axis=1, keepdims=True)
    a = jnp.where(deg > 0, counts / jnp.maximum(deg, 1.0), 0.0)
    h = x
    for layer in range(num_layers):
        w_l, w_r, b = params[layer]
        h = jax.nn.relu(a @ (h @ w_l) + h @ w_r + b)
    w_l, w_r, b = params[-1]
    h = a @ (h @ w_l) + h @ w_r + b
    return jax.nn.log_softmax(h, axis=1)


# ---------------------------------------------------------------------------
if __name__ == "__main__":
    key = jax.random.PRNGKey(0)

    num_nodes = 200          # padded internally to 256
    in_channels = 16
    hidden_channels = 32
    out_channels = 8
    num_edges = 800
    num_layers = 2

    k_x, k_e0, k_e1, k_p = jax.random.split(key, 4)
    x = jax.random.normal(k_x, (num_nodes, in_channels), jnp.float32)
    edge_index = jnp.stack([
        jax.random.randint(k_e0, (num_edges,), 0, num_nodes, dtype=jnp.int32),
        jax.random.randint(k_e1, (num_edges,), 0, num_nodes, dtype=jnp.int32),
    ], axis=0)                                           # (2, E)

    params = init_sage_params(k_p, in_channels, hidden_channels, out_channels,
                              num_layers=num_layers)

    out = graphsage_forward(x, edge_index, params, num_layers=num_layers)
    out = jax.block_until_ready(out)

    assert out.shape == (num_nodes, out_channels)
    assert bool(jnp.all(jnp.isfinite(out)))
    # rows of log_softmax should sum (in prob space) to ~1
    assert jnp.allclose(jnp.sum(jnp.exp(out), axis=1), 1.0, atol=1e-3)

    # compare against the f32 reference (bf16 projections -> loose tolerance)
    ref = _reference_forward(x, edge_index, params, num_layers)
    max_err = float(jnp.max(jnp.abs(out - ref)))
    assert max_err < 0.25, max_err

    print("KERNEL_OK")
</pallas_src>

<mosaic_0001>
module attributes {stable_mosaic.version = 11 : i64} {
  func.func @_proj_kernel(%arg0: i32, %arg1: memref<256x128xbf16, #tpu.memory_space<vmem>>, %arg2: memref<128x256xbf16, #tpu.memory_space<vmem>>, %arg3: memref<1x256xf32, #tpu.memory_space<vmem>>, %arg4: memref<256x128xbf16, #tpu.memory_space<vmem>>, %arg5: memref<256x128xf32, #tpu.memory_space<vmem>>) attributes {dimension_semantics = [#tpu.dimension_semantics<parallel>], iteration_bounds = array<i64: 1>, scalar_prefetch = 0 : i64, scratch_operands = 0 : i64, tpu.core_type = #tpu.core_type<tc>, window_params = [{transform_indices = @transform_0, window_bounds = array<i64: 256, 128>}, {pipeline_mode = #tpu.pipeline_mode<synchronous>, transform_indices = @transform_1, window_bounds = array<i64: 128, 256>}, {pipeline_mode = #tpu.pipeline_mode<synchronous>, transform_indices = @transform_2, window_bounds = array<i64: 1, 256>}, {transform_indices = @transform_3, window_bounds = array<i64: 256, 128>}, {transform_indices = @transform_4, window_bounds = array<i64: 256, 128>}]} {
    %c0 = arith.constant 0 : index
    %c0_0 = arith.constant 0 : index
    %0 = vector.load %arg1[%c0, %c0_0] : memref<256x128xbf16, #tpu.memory_space<vmem>>, vector<256x128xbf16>
    %c0_1 = arith.constant 0 : index
    %c0_2 = arith.constant 0 : index
    %1 = vector.load %arg2[%c0_1, %c0_2] : memref<128x256xbf16, #tpu.memory_space<vmem>>, vector<128x256xbf16>
    %cst = arith.constant dense<0.000000e+00> : vector<256x256xf32>
    %2 = tpu.matmul %0, %1, %cst {dimension_numbers = #tpu.dot_dimension_numbers<[1], [0], [0], [1], [0, 0, 1, 1], [], []>} : vector<256x128xbf16>, vector<128x256xbf16>, vector<256x256xf32> -> vector<256x256xf32>
    %c0_3 = arith.constant 0 : index
    %c0_4 = arith.constant 0 : index
    %3 = vector.load %arg3[%c0_3, %c0_4] : memref<1x256xf32, #tpu.memory_space<vmem>>, vector<1x256xf32>
    %4 = vector.broadcast %3 : vector<1x256xf32> to vector<256x256xf32>
    %5 = arith.addf %2, %4 : vector<256x256xf32>
    %6 = vector.extract_strided_slice %5 {offsets = [0, 0], sizes = [256, 128], strides = [1, 1]} : vector<256x256xf32> to vector<256x128xf32>
    %7 = arith.truncf %6 : vector<256x128xf32> to vector<256x128xbf16>
    %c0_5 = arith.constant 0 : index
    %c0_6 = arith.constant 0 : index
    %8 = vector.load %arg4[%c0_5, %c0_6] : memref<256x128xbf16, #tpu.memory_space<vmem>>, vector<256x128xbf16>
    tpu.vector_store %arg4[%c0_5, %c0_6], %7 {strides = array<i32>} : memref<256x128xbf16, #tpu.memory_space<vmem>>, vector<256x128xbf16>,
    %9 = vector.extract_strided_slice %5 {offsets = [0, 128], sizes = [256, 128], strides = [1, 1]} : vector<256x256xf32> to vector<256x128xf32>
    %c0_7 = arith.constant 0 : index
    %c0_8 = arith.constant 0 : index
    %10 = vector.load %arg5[%c0_7, %c0_8] : memref<256x128xf32, #tpu.memory_space<vmem>>, vector<256x128xf32>
    tpu.vector_store %arg5[%c0_7, %c0_8], %9 {strides = array<i32>} : memref<256x128xf32, #tpu.memory_space<vmem>>, vector<256x128xf32>,
    return
  }
  func.func @transform_0(%arg0: i32) -> (i32, i32) {
    %c0_i32 = arith.constant 0 : i32
    %c0_i32_0 = arith.constant 0 : i32
    return %arg0, %c0_i32 : i32, i32
  }
  func.func @transform_1(%arg0: i32) -> (i32, i32) {
    %c0_i32 = arith.constant 0 : i32
    %c0_i32_0 = arith.constant 0 : i32
    %c0_i32_1 = arith.constant 0 : i32
    return %c0_i32, %c0_i32_0 : i32, i32
  }
  func.func @transform_2(%arg0: i32) -> (i32, i32) {
    %c0_i32 = arith.constant 0 : i32
    %c0_i32_0 = arith.constant 0 : i32
    %c0_i32_1 = arith.constant 0 : i32
    return %c0_i32, %c0_i32_0 : i32, i32
  }
  func.func @transform_3(%arg0: i32) -> (i32, i32) {
    %c0_i32 = arith.constant 0 : i32
    %c0_i32_0 = arith.constant 0 : i32
    return %arg0, %c0_i32 : i32, i32
  }
  func.func @transform_4(%arg0: i32) -> (i32, i32) {
    %c0_i32 = arith.constant 0 : i32
    %c0_i32_0 = arith.constant 0 : i32
    return %arg0, %c0_i32 : i32, i32
  }
}

</mosaic_0001>

<bundles_post_ra>
// kernel: tpu_custom_call.1
= control target key start
LH: loop header
LB: loop body
LE: loop exit
PB: predicated region body
PF: predicated region fallthrough
CT: control target
= control target key end

     0   :  { %10 = vsyncpa [#allocation3], 0  ;;  %s1142_s0 = inlined_call_operand.hbm [shape: bf16[256,128], index: 0, kind: input, shape index: {}]   ;;  %s1143_s1 = inlined_call_operand.hbm [shape: bf16[128,256], index: 1, kind: input, shape index: {}]   ;;  %s1144_s2 = inlined_call_operand.hbm [shape: f32[1,256], index: 2, kind: input, shape index: {}]   ;;  %s1145_s3 = inlined_call_operand.hbm [shape: bf16[256,128], index: 3, kind: output, shape index: {0}]   ;;  %s1146_s4 = inlined_call_operand.hbm [shape: f32[256,128], index: 4, kind: output, shape index: {1}]  }
   0x1   :  { %11 = vsyncpa [#allocation6], 0 }
   0x2   :  { %12 = vsyncpa [#allocation4], 0  ;;  %s31_s17 = sshll.u32 %s1143_s1, 4  ;;  %s32_s17 = int_to_ptr.hbm [resolvable:$true] %s31_s17 }
   0x3   :  { %13 = vsyncpa [#allocation10], 0  ;;  %s1013_s18 = smov [#allocation5]   ;;  %s18_s22 = sshll.u32 %s1142_s0, 4  ;;  %s19_s22 = int_to_ptr.hbm [resolvable:$true] %s18_s22 }
   0x4   :  { %s33_s19 = sshll.u32 %s1013_s18, 4  ;;  %s1014_s23 = smov 128   ;;  %s34_s19 = int_to_ptr.vmem [resolvable:$true] %s33_s19 }
   0x5   :  { %s1015_s24 = smov 8   ;;  %s1016_s25 = smov [#allocation2]  }
   0x6   :  { %39 = dma.hbm_to_vmem [thread:$0]  %s32_s17, 2048, %s34_s19, [#allocation6], %s1014_s23, %s1014_s23, %s1015_s24  }
   0x7   :  { %s20_s26 = sshll.u32 %s1016_s25, 4  ;;  %s1017_s1 = smov 64   ;;  %s21_s26 = int_to_ptr.vmem [resolvable:$true] %s20_s26 }
   0x8   :  { %s1018_s27 = smov 4   ;;  %s45_s0 = sshll.u32 %s1144_s2, 4  ;;  %s46_s0 = int_to_ptr.hbm [resolvable:$true] %s45_s0 }
   0x9   :  { %26 = dma.hbm_to_vmem [thread:$0]  %s19_s22, 2048, %s21_s26, [#allocation3], %s1017_s1, %s1017_s1, %s1018_s27  }
   0xa   :  { %s1019_s30 = smov [#allocation7]  }
   0xb   :  { %s47_s5 = sshll.u32 %s1019_s30, 4  ;;  %s48_s5 = int_to_ptr.vmem [resolvable:$true] %s47_s5 }
   0xc   :  { %50 = dma.hbm_to_vmem [thread:$0]  %s46_s0, 32, %s48_s5, [#allocation6]  }
   0xd   :  { %1005 = dma.done.wait [#allocation3], 2048  }
   0xe   :  { %1006 = vsyncadd [#allocation3], 4294965248 }
   0xf   :  { %1007 = dma.done.wait [#allocation6], 2080  }
  0x10   :  { %1008 = vsyncadd [#allocation6], 4294965216  ;;  %v727_v0 = vld [vmem:[#allocation5 + $0x70] sm:$0xf]  ;;  %v764_v1 = vld [vmem:[#allocation5 + $0x74] sm:$0xf0] }
  0x11   :  { %v763_v2 = vld [vmem:[#allocation5 + $0x74] sm:$0xf]  ;;  %v728_v3 = vor.u32 %v764_v1, %v727_v0  ;;  %v729_v4 = vld [vmem:[#allocation5 + $0x78] sm:$0xf0]  ;;  %v719_v5 = vld [vmem:[#allocation5 + $0x60] sm:$0xf] }
  0x12   :  { %v762_v6 = vld [vmem:[#allocation5 + $0x64] sm:$0xf0]  ;;  %v732_v7 = vor.u32 %v763_v2, %v729_v4  ;;  %v761_v8 = vld [vmem:[#allocation5 + $0x64] sm:$0xf]  ;;  %v721_v9 = vld [vmem:[#allocation5 + $0x68] sm:$0xf0] }
  0x13   :  { %293 = vmatpush.bf16.msra.mxu0 %v728_v3  ;;  %860 = vmatpush.bf16.msra.mxu2 %v728_v3  ;;  %v720_v10 = vor.u32 %v762_v6, %v719_v5  ;;  %v724_v11 = vor.u32 %v761_v8, %v721_v9  ;;  %v711_v12 = vld [vmem:[#allocation5 + $0x50] sm:$0xf]  ;;  %v760_v13 = vld [vmem:[#allocation5 + $0x54] sm:$0xf0]  ;;  %v759_v14 = vld [vmem:[#allocation5 + $0x54] sm:$0xf] }
  0x14   :  { %382 = vmatpush.bf16.msra.mxu1 %v732_v7  ;;  %868 = vmatpush.bf16.msra.mxu3 %v732_v7  ;;  %v713_v15 = vld [vmem:[#allocation5 + $0x58] sm:$0xf0]  ;;  %v712_v16 = vor.u32 %v760_v13, %v711_v12  ;;  %v703_v18 = vld [vmem:[#allocation5 + $0x40] sm:$0xf]  ;;  %v758_v19 = vld [vmem:[#allocation5 + $0x44] sm:$0xf0] }
  0x15   :  { %v716_v17 = vor.u32 %v759_v14, %v713_v15  ;;  %v757_v20 = vld [vmem:[#allocation5 + $0x44] sm:$0xf]  ;;  %v705_v21 = vld [vmem:[#allocation5 + $0x48] sm:$0xf0]  ;;  %v704_v22 = vor.u32 %v758_v19, %v703_v18  ;;  %v695_v24 = vld [vmem:[#allocation5 + $0x30] sm:$0xf] }
  0x16   :  { %v708_v23 = vor.u32 %v757_v20, %v705_v21  ;;  %v756_v25 = vld [vmem:[#allocation5 + $0x34] sm:$0xf0]  ;;  %v755_v26 = vld [vmem:[#allocation5 + $0x34] sm:$0xf]  ;;  %v697_v27 = vld [vmem:[#allocation5 + $0x38] sm:$0xf0] }
  0x17   :  { %294 = vmatpush.bf16.msra.mxu0 %v720_v10  ;;  %861 = vmatpush.bf16.msra.mxu2 %v720_v10  ;;  %v696_v28 = vor.u32 %v756_v25, %v695_v24  ;;  %v700_v29 = vor.u32 %v755_v26, %v697_v27  ;;  %v687_v30 = vld [vmem:[#allocation5 + $0x20] sm:$0xf]  ;;  %v754_v31 = vld [vmem:[#allocation5 + $0x24] sm:$0xf0]  ;;  %v753_v32 = vld [vmem:[#allocation5 + $0x24] sm:$0xf] }
  0x18   :  { %383 = vmatpush.bf16.msra.mxu1 %v724_v11  ;;  %869 = vmatpush.bf16.msra.mxu3 %v724_v11  ;;  %v689_v33 = vld [vmem:[#allocation5 + $0x28] sm:$0xf0]  ;;  %v688_v34 = vor.u32 %v754_v31, %v687_v30  ;;  %v679_v36 = vld [vmem:[#allocation5 + $0x10] sm:$0xf]  ;;  %v752_v37 = vld [vmem:[#allocation5 + $0x14] sm:$0xf0] }
  0x19   :  { %v692_v35 = vor.u32 %v753_v32, %v689_v33  ;;  %v751_v38 = vld [vmem:[#allocation5 + $0x14] sm:$0xf]  ;;  %v681_v39 = vld [vmem:[#allocation5 + $0x18] sm:$0xf0]  ;;  %v680_v40 = vor.u32 %v752_v37, %v679_v36  ;;  %v671_v42 = vld [vmem:[#allocation5] sm:$0xf] }
  0x1a   :  { %v684_v41 = vor.u32 %v751_v38, %v681_v39  ;;  %v750_v43 = vld [vmem:[#allocation5 + $0x4] sm:$0xf0]  ;;  %v749_v44 = vld [vmem:[#allocation5 + $0x4] sm:$0xf]  ;;  %v673_v45 = vld [vmem:[#allocation5 + $0x8] sm:$0xf0] }
  0x1b   :  { %295 = vmatpush.bf16.msra.mxu0 %v712_v16  ;;  %862 = vmatpush.bf16.msra.mxu2 %v712_v16  ;;  %v672_v46 = vor.u32 %v750_v43, %v671_v42  ;;  %v676_v47 = vor.u32 %v749_v44, %v673_v45  ;;  %v733_v48 = vld [vmem:[#allocation2] sm:$0xff]  ;;  %v734_v50 = vld [vmem:[#allocation2 + $0x8] sm:$0xff]  ;;  %v735_v52 = vld [vmem:[#allocation2 + $0x10] sm:$0xff]  ;;  %s1020_s2 = smov [#allocation9]   ;;  %s586_s9 = sshll.u32 %s1146_s4, 4  ;;  %s587_s9 = int_to_ptr.hbm [resolvable:$true] %s586_s9 }
  0x1c   :  { %384 = vmatpush.bf16.msra.mxu1 %v716_v17  ;;  %870 = vmatpush.bf16.msra.mxu3 %v716_v17  ;;  %v741_v49 = vld [vmem:[#allocation2 + $0x40] sm:$0xff]  ;;  %v742_v51 = vld [vmem:[#allocation2 + $0x48] sm:$0xff]  ;;  %v743_v53 = vld [vmem:[#allocation2 + $0x50] sm:$0xff]  ;;  %s584_s6 = sshll.u32 %s1020_s2, 4  ;;  %s1021_s10 = smov [#allocation8]   ;;  %s585_s6 = int_to_ptr.vmem [resolvable:$true] %s584_s6 }
  0x1d   :  { %v736_v54 = vld [vmem:[#allocation2 + $0x18] sm:$0xff]  ;;  %v737_v56 = vld [vmem:[#allocation2 + $0x20] sm:$0xff]  ;;  %v738_v58 = vld [vmem:[#allocation2 + $0x28] sm:$0xff]  ;;  %s571_s11 = sshll.u32 %s1021_s10, 4  ;;  %s573_s14 = sshll.u32 %s1145_s3, 4  ;;  %s572_s11 = int_to_ptr.vmem [resolvable:$true] %s571_s11  ;;  %s574_s14 = int_to_ptr.hbm [resolvable:$true] %s573_s14 }
  0x1e   :  { %v744_v55 = vld [vmem:[#allocation2 + $0x58] sm:$0xff]  ;;  %v745_v57 = vld [vmem:[#allocation2 + $0x60] sm:$0xff]  ;;  %v746_v59 = vld [vmem:[#allocation2 + $0x68] sm:$0xff] }
  0x1f   :  { %296 = vmatpush.bf16.msra.mxu0 %v704_v22  ;;  %863 = vmatpush.bf16.msra.mxu2 %v704_v22  ;;  %v739_v60 = vld [vmem:[#allocation2 + $0x30] sm:$0xff]  ;;  %v740_v62 = vld [vmem:[#allocation2 + $0x38] sm:$0xff]  ;;  %v111_v0 = vld [vmem:[#allocation7] sm:$0x3] }
  0x20   :  { %385 = vmatpush.bf16.msra.mxu1 %v708_v23  ;;  %871 = vmatpush.bf16.msra.mxu3 %v708_v23  ;;  %v747_v61 = vld [vmem:[#allocation2 + $0x70] sm:$0xff]  ;;  %v748_v63 = vld [vmem:[#allocation2 + $0x78] sm:$0xff]  ;;  %v1062_v1 = vperm.slane %v111_v0, 1  ;;  %v1065_v5 = vperm.slane %v111_v0, 0 }
  0x23   :  { %297 = vmatpush.bf16.msra.mxu0 %v696_v28  ;;  %864 = vmatpush.bf16.msra.mxu2 %v696_v28 }
  0x24   :  { %386 = vmatpush.bf16.msra.mxu1 %v700_v29  ;;  %872 = vmatpush.bf16.msra.mxu3 %v700_v29 }
  0x27   :  { %298 = vmatpush.bf16.msra.mxu0 %v688_v34  ;;  %865 = vmatpush.bf16.msra.mxu2 %v688_v34 }
  0x28   :  { %387 = vmatpush.bf16.msra.mxu1 %v692_v35  ;;  %873 = vmatpush.bf16.msra.mxu3 %v692_v35 }
  0x2b   :  { %299 = vmatpush.bf16.msra.mxu0 %v680_v40  ;;  %866 = vmatpush.bf16.msra.mxu2 %v680_v40 }
  0x2c   :  { %388 = vmatpush.bf16.msra.mxu1 %v684_v41  ;;  %874 = vmatpush.bf16.msra.mxu3 %v684_v41 }
  0x2f   :  { %300 = vmatpush.bf16.msra.mxu0 %v672_v46  ;;  %867 = vmatpush.bf16.msra.mxu2 %v672_v46 }
  0x30   :  { %389 = vmatpush.bf16.msra.mxu1 %v676_v47  ;;  %875 = vmatpush.bf16.msra.mxu3 %v676_v47 }
  0x32   :  { %301 = vmatmul.bf16.vlgmr.msra.gmra.mxu0 %v733_v48  ;;  %341 = vmatmul.bf16.vlgmr.msra.gmra.mxu2 %v741_v49 }
  0x33   :  { %390 = vmatmul.bf16.vlgmr.msra.gmra.mxu1 %v733_v48  ;;  %430 = vmatmul.bf16.vlgmr.msra.gmra.mxu3 %v741_v49 }
  0x42   :  { %306 = vmatmul.bf16.gmra.mxu0 %v734_v50  ;;  %346 = vmatmul.bf16.gmra.mxu2 %v742_v51 }
  0x43   :  { %395 = vmatmul.bf16.gmra.mxu1 %v734_v50  ;;  %435 = vmatmul.bf16.gmra.mxu3 %v742_v51 }
  0x52   :  { %311 = vmatmul.bf16.gmra.mxu0 %v735_v52  ;;  %351 = vmatmul.bf16.gmra.mxu2 %v743_v53 }
  0x53   :  { %400 = vmatmul.bf16.gmra.mxu1 %v735_v52  ;;  %440 = vmatmul.bf16.gmra.mxu3 %v743_v53 }
  0x62   :  { %316 = vmatmul.bf16.gmra.mxu0 %v736_v54  ;;  %356 = vmatmul.bf16.gmra.mxu2 %v744_v55 }
  0x63   :  { %405 = vmatmul.bf16.gmra.mxu1 %v736_v54  ;;  %445 = vmatmul.bf16.gmra.mxu3 %v744_v55 }
  0x72   :  { %321 = vmatmul.bf16.gmra.mxu0 %v737_v56  ;;  %361 = vmatmul.bf16.gmra.mxu2 %v745_v57 }
  0x73   :  { %410 = vmatmul.bf16.gmra.mxu1 %v737_v56  ;;  %450 = vmatmul.bf16.gmra.mxu3 %v745_v57 }
  0x82   :  { %326 = vmatmul.bf16.gmra.mxu0 %v738_v58  ;;  %366 = vmatmul.bf16.gmra.mxu2 %v746_v59 }
  0x83   :  { %415 = vmatmul.bf16.gmra.mxu1 %v738_v58  ;;  %455 = vmatmul.bf16.gmra.mxu3 %v746_v59 }
  0x92   :  { %331 = vmatmul.bf16.gmra.mxu0 %v739_v60  ;;  %371 = vmatmul.bf16.gmra.mxu2 %v747_v61 }
  0x93   :  { %420 = vmatmul.bf16.gmra.mxu1 %v739_v60  ;;  %460 = vmatmul.bf16.gmra.mxu3 %v747_v61 }
  0xa2   :  { %336 = vmatmul.bf16.gmra.mxu0 %v740_v62  ;;  %376 = vmatmul.bf16.gmra.mxu2 %v748_v63 }
  0xa3   :  { %425 = vmatmul.bf16.gmra.mxu1 %v740_v62  ;;  %465 = vmatmul.bf16.gmra.mxu3 %v748_v63 }
  0xaf   :  { %v302_v2 = vpop.f32.mrf.mxu0 }
  0xb0   :  { %v391_v3 = vpop.f32.mrf.mxu1  ;;  %v303_v10 = vadd.f32 %v302_v2, %v1065_v5 }
  0xb1   :  { %v392_v4 = vadd.f32 %v391_v3, %v1062_v1 }
  0xb3   :  { %535 = vst [vmem:[#allocation9] sm:$0xff] %v392_v4 }
  0xb5   :  { %v342_v6 = vpop.f32.mrf.mxu2 }
  0xb6   :  { %v431_v7 = vpop.f32.mrf.mxu3  ;;  %v343_v16 = vadd.f32 %v342_v6, %v1065_v5 }
  0xb7   :  { %v432_v8 = vadd.f32 %v431_v7, %v1062_v1  ;;  %v304_v9 = vpop.f32.mrf.mxu0 }
  0xb8   :  { %v305_v11 = vadd.f32 %v304_v9, %v1065_v5  ;;  %v393_v12 = vpop.f32.mrf.mxu1 }
  0xb9   :  { %551 = vst [vmem:[#allocation9 + $0x80] sm:$0xff] %v432_v8  ;;  %v394_v13 = vadd.f32 %v393_v12, %v1062_v1 }
  0xba   :  { %v768_v14 = vpack.c.bf16 %v305_v11, %v303_v10 }
  0xbb   :  { %536 = vst [vmem:[#allocation9 + $0x8] sm:$0xff] %v394_v13 }
  0xbc   :  { %769 = vst [vmem:[#allocation8] sm:$0xff] %v768_v14  }
  0xbd   :  { %v344_v15 = vpop.f32.mrf.mxu2 }
  0xbe   :  { %v345_v17 = vadd.f32 %v344_v15, %v1065_v5  ;;  %v433_v18 = vpop.f32.mrf.mxu3 }
  0xbf   :  { %v434_v19 = vadd.f32 %v433_v18, %v1062_v1  ;;  %v307_v20 = vpop.f32.mrf.mxu0 }
  0xc0   :  { %v808_v21 = vpack.c.bf16 %v345_v17, %v343_v16  ;;  %v396_v22 = vpop.f32.mrf.mxu1  ;;  %v308_v28 = vadd.f32 %v307_v20, %v1065_v5 }
  0xc1   :  { %552 = vst [vmem:[#allocation9 + $0x88] sm:$0xff] %v434_v19  ;;  %v397_v23 = vadd.f32 %v396_v22, %v1062_v1 }
  0xc2   :  { %852 = vst [vmem:[#allocation8 + $0x40] sm:$0xff] %v808_v21  }
  0xc3   :  { %537 = vst [vmem:[#allocation9 + $0x10] sm:$0xff] %v397_v23 }
  0xc5   :  { %v347_v24 = vpop.f32.mrf.mxu2 }
  0xc6   :  { %v436_v25 = vpop.f32.mrf.mxu3  ;;  %v348_v34 = vadd.f32 %v347_v24, %v1065_v5 }
  0xc7   :  { %v437_v26 = vadd.f32 %v436_v25, %v1062_v1  ;;  %v309_v27 = vpop.f32.mrf.mxu0 }
  0xc8   :  { %v310_v29 = vadd.f32 %v309_v27, %v1065_v5  ;;  %v398_v30 = vpop.f32.mrf.mxu1 }
  0xc9   :  { %553 = vst [vmem:[#allocation9 + $0x90] sm:$0xff] %v437_v26  ;;  %v399_v31 = vadd.f32 %v398_v30, %v1062_v1 }
  0xca   :  { %v773_v32 = vpack.c.bf16 %v310_v29, %v308_v28 }
  0xcb   :  { %538 = vst [vmem:[#allocation9 + $0x18] sm:$0xff] %v399_v31 }
  0xcc   :  { %845 = vst [vmem:[#allocation8 + $0x8] sm:$0xff] %v773_v32  }
  0xcd   :  { %v349_v33 = vpop.f32.mrf.mxu2 }
  0xce   :  { %v350_v35 = vadd.f32 %v349_v33, %v1065_v5  ;;  %v438_v36 = vpop.f32.mrf.mxu3 }
  0xcf   :  { %v439_v37 = vadd.f32 %v438_v36, %v1062_v1  ;;  %v312_v38 = vpop.f32.mrf.mxu0 }
  0xd0   :  { %v813_v39 = vpack.c.bf16 %v350_v35, %v348_v34  ;;  %v401_v40 = vpop.f32.mrf.mxu1  ;;  %v313_v46 = vadd.f32 %v312_v38, %v1065_v5 }
  0xd1   :  { %554 = vst [vmem:[#allocation9 + $0x98] sm:$0xff] %v439_v37  ;;  %v402_v41 = vadd.f32 %v401_v40, %v1062_v1 }
  0xd2   :  { %853 = vst [vmem:[#allocation8 + $0x48] sm:$0xff] %v813_v39  }
  0xd3   :  { %539 = vst [vmem:[#allocation9 + $0x20] sm:$0xff] %v402_v41 }
  0xd5   :  { %v352_v42 = vpop.f32.mrf.mxu2 }
  0xd6   :  { %v441_v43 = vpop.f32.mrf.mxu3  ;;  %v353_v52 = vadd.f32 %v352_v42, %v1065_v5 }
  0xd7   :  { %v442_v44 = vadd.f32 %v441_v43, %v1062_v1  ;;  %v314_v45 = vpop.f32.mrf.mxu0 }
  0xd8   :  { %v315_v47 = vadd.f32 %v314_v45, %v1065_v5  ;;  %v403_v48 = vpop.f32.mrf.mxu1 }
  0xd9   :  { %555 = vst [vmem:[#allocation9 + $0xa0] sm:$0xff] %v442_v44  ;;  %v404_v49 = vadd.f32 %v403_v48, %v1062_v1 }
  0xda   :  { %v778_v50 = vpack.c.bf16 %v315_v47, %v313_v46 }
  0xdb   :  { %540 = vst [vmem:[#allocation9 + $0x28] sm:$0xff] %v404_v49 }
  0xdc   :  { %846 = vst [vmem:[#allocation8 + $0x10] sm:$0xff] %v778_v50  }
  0xdd   :  { %v354_v51 = vpop.f32.mrf.mxu2 }
  0xde   :  { %v355_v53 = vadd.f32 %v354_v51, %v1065_v5  ;;  %v443_v54 = vpop.f32.mrf.mxu3 }
  0xdf   :  { %v444_v55 = vadd.f32 %v443_v54, %v1062_v1  ;;  %v317_v56 = vpop.f32.mrf.mxu0 }
  0xe0   :  { %v818_v57 = vpack.c.bf16 %v355_v53, %v353_v52  ;;  %v406_v58 = vpop.f32.mrf.mxu1  ;;  %v318_v0 = vadd.f32 %v317_v56, %v1065_v5 }
  0xe1   :  { %556 = vst [vmem:[#allocation9 + $0xa8] sm:$0xff] %v444_v55  ;;  %v407_v59 = vadd.f32 %v406_v58, %v1062_v1 }
  0xe2   :  { %854 = vst [vmem:[#allocation8 + $0x50] sm:$0xff] %v818_v57  }
  0xe3   :  { %541 = vst [vmem:[#allocation9 + $0x30] sm:$0xff] %v407_v59 }
  0xe5   :  { %v357_v60 = vpop.f32.mrf.mxu2 }
  0xe6   :  { %v446_v61 = vpop.f32.mrf.mxu3  ;;  %v358_v8 = vadd.f32 %v357_v60, %v1065_v5 }
  0xe7   :  { %v447_v62 = vadd.f32 %v446_v61, %v1062_v1  ;;  %v319_v63 = vpop.f32.mrf.mxu0 }
  0xe8   :  { %v320_v2 = vadd.f32 %v319_v63, %v1065_v5  ;;  %v408_v3 = vpop.f32.mrf.mxu1 }
  0xe9   :  { %557 = vst [vmem:[#allocation9 + $0xb0] sm:$0xff] %v447_v62  ;;  %v409_v4 = vadd.f32 %v408_v3, %v1062_v1 }
  0xea   :  { %v783_v6 = vpack.c.bf16 %v320_v2, %v318_v0 }
  0xeb   :  { %542 = vst [vmem:[#allocation9 + $0x38] sm:$0xff] %v409_v4 }
  0xec   :  { %847 = vst [vmem:[#allocation8 + $0x18] sm:$0xff] %v783_v6  }
  0xed   :  { %v359_v7 = vpop.f32.mrf.mxu2 }
  0xee   :  { %v360_v9 = vadd.f32 %v359_v7, %v1065_v5  ;;  %v448_v10 = vpop.f32.mrf.mxu3 }
  0xef   :  { %v449_v11 = vadd.f32 %v448_v10, %v1062_v1  ;;  %v322_v12 = vpop.f32.mrf.mxu0 }
  0xf0   :  { %v823_v13 = vpack.c.bf16 %v360_v9, %v358_v8  ;;  %v411_v14 = vpop.f32.mrf.mxu1  ;;  %v323_v20 = vadd.f32 %v322_v12, %v1065_v5 }
  0xf1   :  { %558 = vst [vmem:[#allocation9 + $0xb8] sm:$0xff] %v449_v11  ;;  %v412_v15 = vadd.f32 %v411_v14, %v1062_v1 }
  0xf2   :  { %855 = vst [vmem:[#allocation8 + $0x58] sm:$0xff] %v823_v13  }
  0xf3   :  { %543 = vst [vmem:[#allocation9 + $0x40] sm:$0xff] %v412_v15 }
  0xf5   :  { %v362_v16 = vpop.f32.mrf.mxu2 }
  0xf6   :  { %v451_v17 = vpop.f32.mrf.mxu3  ;;  %v363_v26 = vadd.f32 %v362_v16, %v1065_v5 }
  0xf7   :  { %v452_v18 = vadd.f32 %v451_v17, %v1062_v1  ;;  %v324_v19 = vpop.f32.mrf.mxu0 }
  0xf8   :  { %v325_v21 = vadd.f32 %v324_v19, %v1065_v5  ;;  %v413_v22 = vpop.f32.mrf.mxu1 }
  0xf9   :  { %559 = vst [vmem:[#allocation9 + $0xc0] sm:$0xff] %v452_v18  ;;  %v414_v23 = vadd.f32 %v413_v22, %v1062_v1 }
  0xfa   :  { %v788_v24 = vpack.c.bf16 %v325_v21, %v323_v20 }
  0xfb   :  { %544 = vst [vmem:[#allocation9 + $0x48] sm:$0xff] %v414_v23 }
  0xfc   :  { %848 = vst [vmem:[#allocation8 + $0x20] sm:$0xff] %v788_v24  }
  0xfd   :  { %v364_v25 = vpop.f32.mrf.mxu2 }
  0xfe   :  { %v365_v27 = vadd.f32 %v364_v25, %v1065_v5  ;;  %v453_v28 = vpop.f32.mrf.mxu3 }
  0xff   :  { %v454_v29 = vadd.f32 %v453_v28, %v1062_v1  ;;  %v327_v30 = vpop.f32.mrf.mxu0 }
 0x100   :  { %v828_v31 = vpack.c.bf16 %v365_v27, %v363_v26  ;;  %v416_v32 = vpop.f32.mrf.mxu1  ;;  %v328_v38 = vadd.f32 %v327_v30, %v1065_v5 }
 0x101   :  { %560 = vst [vmem:[#allocation9 + $0xc8] sm:$0xff] %v454_v29  ;;  %v417_v33 = vadd.f32 %v416_v32, %v1062_v1 }
 0x102   :  { %856 = vst [vmem:[#allocation8 + $0x60] sm:$0xff] %v828_v31  }
 0x103   :  { %545 = vst [vmem:[#allocation9 + $0x50] sm:$0xff] %v417_v33 }
 0x105   :  { %v367_v34 = vpop.f32.mrf.mxu2 }
 0x106   :  { %v456_v35 = vpop.f32.mrf.mxu3  ;;  %v368_v44 = vadd.f32 %v367_v34, %v1065_v5 }
 0x107   :  { %v457_v36 = vadd.f32 %v456_v35, %v1062_v1  ;;  %v329_v37 = vpop.f32.mrf.mxu0 }
 0x108   :  { %v330_v39 = vadd.f32 %v329_v37, %v1065_v5  ;;  %v418_v40 = vpop.f32.mrf.mxu1 }
 0x109   :  { %561 = vst [vmem:[#allocation9 + $0xd0] sm:$0xff] %v457_v36  ;;  %v419_v41 = vadd.f32 %v418_v40, %v1062_v1 }
 0x10a   :  { %v793_v42 = vpack.c.bf16 %v330_v39, %v328_v38 }
 0x10b   :  { %546 = vst [vmem:[#allocation9 + $0x58] sm:$0xff] %v419_v41 }
 0x10c   :  { %849 = vst [vmem:[#allocation8 + $0x28] sm:$0xff] %v793_v42  }
 0x10d   :  { %v369_v43 = vpop.f32.mrf.mxu2 }
 0x10e   :  { %v370_v45 = vadd.f32 %v369_v43, %v1065_v5  ;;  %v458_v46 = vpop.f32.mrf.mxu3 }
 0x10f   :  { %v459_v47 = vadd.f32 %v458_v46, %v1062_v1  ;;  %v332_v48 = vpop.f32.mrf.mxu0 }
 0x110   :  { %v833_v49 = vpack.c.bf16 %v370_v45, %v368_v44  ;;  %v421_v50 = vpop.f32.mrf.mxu1  ;;  %v333_v56 = vadd.f32 %v332_v48, %v1065_v5 }
 0x111   :  { %562 = vst [vmem:[#allocation9 + $0xd8] sm:$0xff] %v459_v47  ;;  %v422_v51 = vadd.f32 %v421_v50, %v1062_v1 }
 0x112   :  { %857 = vst [vmem:[#allocation8 + $0x68] sm:$0xff] %v833_v49  }
 0x113   :  { %547 = vst [vmem:[#allocation9 + $0x60] sm:$0xff] %v422_v51 }
 0x115   :  { %v372_v52 = vpop.f32.mrf.mxu2 }
 0x116   :  { %v461_v53 = vpop.f32.mrf.mxu3  ;;  %v373_v62 = vadd.f32 %v372_v52, %v1065_v5 }
 0x117   :  { %v462_v54 = vadd.f32 %v461_v53, %v1062_v1  ;;  %v334_v55 = vpop.f32.mrf.mxu0 }
 0x118   :  { %v335_v57 = vadd.f32 %v334_v55, %v1065_v5  ;;  %v423_v58 = vpop.f32.mrf.mxu1 }
 0x119   :  { %563 = vst [vmem:[#allocation9 + $0xe0] sm:$0xff] %v462_v54  ;;  %v424_v59 = vadd.f32 %v423_v58, %v1062_v1 }
 0x11a   :  { %v798_v60 = vpack.c.bf16 %v335_v57, %v333_v56 }
 0x11b   :  { %548 = vst [vmem:[#allocation9 + $0x68] sm:$0xff] %v424_v59 }
 0x11c   :  { %850 = vst [vmem:[#allocation8 + $0x30] sm:$0xff] %v798_v60  }
 0x11d   :  { %v374_v61 = vpop.f32.mrf.mxu2 }
 0x11e   :  { %v375_v63 = vadd.f32 %v374_v61, %v1065_v5  ;;  %v463_v0 = vpop.f32.mrf.mxu3 }
 0x11f   :  { %v464_v2 = vadd.f32 %v463_v0, %v1062_v1  ;;  %v337_v3 = vpop.f32.mrf.mxu0 }
 0x120   :  { %v838_v4 = vpack.c.bf16 %v375_v63, %v373_v62  ;;  %v426_v6 = vpop.f32.mrf.mxu1  ;;  %v338_v12 = vadd.f32 %v337_v3, %v1065_v5 }
 0x121   :  { %564 = vst [vmem:[#allocation9 + $0xe8] sm:$0xff] %v464_v2  ;;  %v427_v7 = vadd.f32 %v426_v6, %v1062_v1 }
 0x122   :  { %858 = vst [vmem:[#allocation8 + $0x70] sm:$0xff] %v838_v4  }
 0x123   :  { %549 = vst [vmem:[#allocation9 + $0x70] sm:$0xff] %v427_v7 }
 0x125   :  { %v377_v8 = vpop.f32.mrf.mxu2 }
 0x126   :  { %v466_v9 = vpop.f32.mrf.mxu3  ;;  %v378_v18 = vadd.f32 %v377_v8, %v1065_v5 }
 0x127   :  { %v467_v10 = vadd.f32 %v466_v9, %v1062_v1  ;;  %v339_v11 = vpop.f32.mrf.mxu0 }
 0x128   :  { %v340_v13 = vadd.f32 %v339_v11, %v1065_v5  ;;  %v428_v14 = vpop.f32.mrf.mxu1 }
 0x129   :  { %565 = vst [vmem:[#allocation9 + $0xf0] sm:$0xff] %v467_v10  ;;  %v429_v15 = vadd.f32 %v428_v14, %v1062_v1 }
 0x12a   :  { %v803_v16 = vpack.c.bf16 %v340_v13, %v338_v12 }
 0x12b   :  { %550 = vst [vmem:[#allocation9 + $0x78] sm:$0xff] %v429_v15 }
 0x12c   :  { %851 = vst [vmem:[#allocation8 + $0x38] sm:$0xff] %v803_v16  }
 0x12d   :  { %v379_v17 = vpop.f32.mrf.mxu2 }
 0x12e   :  { %v380_v19 = vadd.f32 %v379_v17, %v1065_v5  ;;  %v468_v20 = vpop.f32.mrf.mxu3 }
 0x12f   :  { %v469_v21 = vadd.f32 %v468_v20, %v1062_v1 }
 0x130   :  { %v843_v22 = vpack.c.bf16 %v380_v19, %v378_v18 }
 0x131   :  { %566 = vst [vmem:[#allocation9 + $0xf8] sm:$0xff] %v469_v21 }
 0x132   :  { %859 = vst [vmem:[#allocation8 + $0x78] sm:$0xff] %v843_v22   ;;  %592 = dma.vmem_to_hbm [thread:$0]  %s585_s6, 4096, %s587_s9, [#allocation10], %s1014_s23, %s1014_s23, %s1015_s24  }
 0x133   :  { %579 = dma.vmem_to_hbm [thread:$0]  %s572_s11, 2048, %s574_s14, [#allocation4], %s1017_s1, %s1017_s1, %s1018_s27  }
 0x134   :  { %1009 = dma.done.wait [#allocation4], 2048  }
 0x135   :  { %1010 = vsyncadd [#allocation4], 4294965248 }
 0x136   :  { %1011 = dma.done.wait [#allocation10], 4096  }
 0x137   :  { %1012 = vsyncadd [#allocation10], 4294963200 }
 0x138   :  { %601 = vsyncpa [#allocation3], 1 }
 0x139   :  { %602 = vsyncpa [#allocation6], 1 }
 0x13a   :  { %603 = vsyncpa [#allocation4], 1 }
 0x13b   :  { %604 = vsyncpa [#allocation10], 1 }

</bundles_post_ra>
